<compile_context>
chip_gen: v5e
topology: v5e:2x2
jax: 0.10.0
libtpu: 0.0.40
codegen_flags: <defaults>
</compile_context>

<pallas_src>
import functools

import numpy as np
import jax
import jax.numpy as jnp
from jax.experimental import pallas as pl
from jax.experimental.pallas import tpu as pltpu

KH, KW, PAD = 3, 3, 1  # fixed 3x3 conv, padding=1 (the synthetic model_q)


# -----------------------------------------------------------------------------
# Pallas kernel: quant -> fused-im2col quantized conv (+bias) -> requant -> dequant
# One grid step == nb images; output block is [C_out, nb*H*W] (lane-dense).
# -----------------------------------------------------------------------------
def _quant_conv_dequant_kernel(params_ref, x_ref, wq_ref, mask_ref, o_ref, *, w):
    # scalar quantization parameters (SMEM); divisions pre-inverted on the host
    inv_scale_in = params_ref[0]
    zp_in = params_ref[1]
    rescale = params_ref[2]          # scale_in * scale_w (fused requant rescale)
    inv_scale_out = params_ref[3]
    zp_out = params_ref[4]
    scale_out = params_ref[5]

    x = x_ref[...]                   # [C, LANES] f32, LANES = nb * H * W
    c, lanes = x.shape
    c_pad = wq_ref.shape[1] // (KH * KW)

    # --- QuantStub: fake-quantize to the int8 grid, centered by the zero point.
    # (jnp.round is ties-to-even, matching PyTorch quantization rounding.)
    # Centered values are 0 for spatial padding -> exact zero-point padding semantics.
    # TODO(synk): real torch.ao activation observers are quint8 [0,255] with nonzero zp;
    # this synthetic setup uses symmetric int8 with zp=0.
    xq = jnp.clip(jnp.round(x * inv_scale_in) + zp_in, -128.0, 127.0) - zp_in

    # --- in-VMEM channel pad C -> C_pad (no host-side pad, no extra HBM bytes) ---------
    # The first padded sublane is all-ones: it is the "bias lane".  The weight column
    # (center tap, channel C) holds bias/rescale, so the conv matmul adds the bias and no
    # separate VMEM bias input is needed.  Remaining padded sublanes are zero.
    sub = jax.lax.broadcasted_iota(jnp.int32, (c_pad - c, lanes), 0)
    xq = jnp.concatenate([xq, (sub == 0).astype(xq.dtype)], axis=0)   # [C_pad, LANES]

    # --- fused im2col: 9 lane-rolls of the quantized image ---------------------------
    # Validity masks are grid-invariant and host-precomputed (resident VMEM block), so the
    # only per-step elementwise work here is 8 multiplies.  Masks are periodic in the lane
    # index with period H*W: wherever a mask is 1 the roll source stays inside the same
    # image, so lanes may carry nb images at once.
    taps = []
    for di in range(KH):
        for dj in range(KW):
            t = di * KW + dj
            s = (di - PAD) * w + (dj - PAD)      # source offset inside the flattened image
            if s == 0:
                taps.append(xq)                  # center tap: all-valid, no roll, no mask
            else:
                shifted = pltpu.roll(xq, shift=(-s) % lanes, axis=1)
                taps.append(shifted * mask_ref[t])
    # tile-aligned sublane concat (tap pieces are full 8-row tiles): [KH*KW*C_pad, LANES]
    xcol = jnp.concatenate(taps, axis=0).astype(jnp.bfloat16)

    # --- quantized conv: single bf16 MXU matmul, exact f32 accumulation ---------------
    # integer-valued operands <= 128 in magnitude -> bf16 exact; |acc| << 2^24 -> f32 exact
    acc = jnp.dot(wq_ref[...], xcol, preferred_element_type=jnp.float32)  # [C_out, LANES]
    y = acc * rescale                            # bias already folded in via the bias lane

    # --- requantize to the int8 output grid, then DeQuantStub back to float -----------
    yq = jnp.clip(jnp.round(y * inv_scale_out) + zp_out, -128.0, 127.0)
    o_ref[...] = ((yq - zp_out) * scale_out).astype(o_ref.dtype)


# -----------------------------------------------------------------------------
# Host-precomputed, grid-invariant im2col validity masks (resident VMEM constant)
# -----------------------------------------------------------------------------
def _build_masks(h, w, c_pad, nb):
    idx = np.arange(h * w)
    row, col = idx // w, idx % w
    masks = []
    for di in range(KH):
        for dj in range(KW):
            oi, oj = di - PAD, dj - PAD
            masks.append(((row + oi >= 0) & (row + oi < h) &
                          (col + oj >= 0) & (col + oj < w)).astype(np.float32))
    m = np.stack(masks)                                             # [9, H*W]
    m = np.broadcast_to(m[:, None, :], (KH * KW, c_pad, h * w))     # broadcast over sublanes
    return np.ascontiguousarray(np.tile(m, (1, 1, nb)))             # [9, C_pad, nb*H*W]


# -----------------------------------------------------------------------------
# Wrapper: NCHW in/out; batch folded into lanes; >=2 parallel grid steps when N>=2
# -----------------------------------------------------------------------------
@jax.jit
def quantized_model_forward(x_nchw, wq_mat, params):
    """x_nchw: [N, C, H, W] float32 -> [N, C_out, H, W] float32 (NCHW, like PyTorch)."""
    N, C, H, W = x_nchw.shape
    Kout, Kdim = wq_mat.shape
    HW = H * W
    C_pad = Kdim // (KH * KW)

    # nb images per grid step; keep >= 2 steps when N >= 2 so v7x's two TensorCores both
    # get work ("parallel" axis).  Single-TC v5e/v6e: the split is just 2 small steps.
    nb = N // 2 if (N >= 2 and N % (N // 2) == 0) else 1
    steps = N // nb
    lanes = nb * HW
    assert steps == 1 or lanes % 128 == 0, "per-step lane width must be lane-aligned"

    # [N, C, H, W] -> [C, N*HW]: images laid out along the lane dimension, no im2col slab.
    x_lane = x_nchw.reshape(N, C, HW).transpose(1, 0, 2).reshape(C, N * HW)
    masks = jnp.asarray(_build_masks(H, W, C_pad, nb))              # baked constant

    cost = pl.CostEstimate(
        flops=2 * Kout * Kdim * N * HW,
        transcendentals=0,
        bytes_accessed=int(x_lane.size * 4 + wq_mat.size * 2 + masks.size * 4
                           + params.size * 4 + N * Kout * HW * 4),
    )

    kernel = functools.partial(_quant_conv_dequant_kernel, w=W)
    out_lane = pl.pallas_call(
        kernel,
        out_shape=jax.ShapeDtypeStruct((Kout, N * HW), jnp.float32),
        grid=(steps,),
        in_specs=[
            pl.BlockSpec(memory_space=pltpu.SMEM),                        # params [6]
            pl.BlockSpec((C, lanes), lambda g: (0, g)),                   # nb images [C, nb*HW]
            pl.BlockSpec((Kout, Kdim), lambda g: (0, 0)),                 # bf16 weights (resident)
            pl.BlockSpec((KH * KW, C_pad, lanes), lambda g: (0, 0, 0)),   # masks (resident)
        ],
        out_specs=pl.BlockSpec((Kout, lanes), lambda g: (0, g)),          # lane-dense [Kout, nb*HW]
        compiler_params=pltpu.CompilerParams(
            dimension_semantics=("parallel",)),
        cost_estimate=cost,
    )(params, x_lane, wq_mat, masks)

    # [Kout, N*HW] -> NCHW
    return out_lane.reshape(Kout, N, HW).transpose(1, 0, 2).reshape(N, Kout, H, W)


# -----------------------------------------------------------------------------
# Synthetic quantized-model parameters (weights, bias, quantization scales)
# -----------------------------------------------------------------------------
def make_params(key, c_in=4, c_out=8, kh=KH, kw=KW):
    """Deterministic synthetic conv weights + int8 per-tensor symmetric quantization."""
    kw_key, kb_key = jax.random.split(key)
    w = 0.1 * jax.random.normal(kw_key, (c_out, c_in, kh, kw), jnp.float32)
    b = 0.05 * jax.random.normal(kb_key, (c_out,), jnp.float32)

    scale_w = jnp.max(jnp.abs(w)) / 127.0
    wq = jnp.clip(jnp.round(w / scale_w), -127.0, 127.0)          # integer-valued f32

    scale_in = jnp.float32(0.05)
    zp_in = jnp.float32(0.0)
    scale_out = jnp.float32(0.02)
    zp_out = jnp.float32(0.0)
    rescale = scale_in * scale_w

    # Kernel weight layout: [c_out, kh*kw*c_pad], column = (di*kw + dj)*c_pad + c.
    # Channels zero-padded to the sublane width; the column (center tap, channel c_in)
    # carries bias/rescale -- it multiplies the kernel's all-ones "bias lane".
    # NOTE: bias therefore rides the MXU in bf16 (not torch's int32-quantized bias);
    # worst case is a single output-LSB (one quant step) difference near rounding ties.
    c_pad = max(8, ((c_in + 7) // 8) * 8)
    wq_blk = jnp.zeros((c_out, kh * kw, c_pad), jnp.float32)
    wq_blk = wq_blk.at[:, :, :c_in].set(
        jnp.transpose(wq, (0, 2, 3, 1)).reshape(c_out, kh * kw, c_in))
    center = (kh // 2) * kw + (kw // 2)
    wq_blk = wq_blk.at[:, center, c_in].set(b / rescale)
    wq_mat = wq_blk.reshape(c_out, kh * kw * c_pad).astype(jnp.bfloat16)  # |wq|<=127: exact

    params = jnp.stack([
        1.0 / scale_in,            # inv_scale_in
        zp_in,                     # zp_in
        rescale,                   # fused requant rescale (scale_in * scale_w)
        1.0 / scale_out,           # inv_scale_out
        zp_out,                    # zp_out
        scale_out,                 # scale_out (DeQuantStub)
    ]).astype(jnp.float32)
    return wq_mat, b, params


# -----------------------------------------------------------------------------
# Pure-JAX reference of the same fake-quant conv (sanity check only)
# -----------------------------------------------------------------------------
def _reference_forward(x_nchw, wq_mat, bias, params):
    inv_s_in, zp_in, rescale, inv_s_out, zp_out, s_out = (params[i] for i in range(6))
    N, C, H, W = x_nchw.shape
    Kout, Kdim = wq_mat.shape
    c_pad = Kdim // (KH * KW)
    wk = wq_mat.astype(jnp.float32).reshape(Kout, KH * KW, c_pad)[:, :, :C]
    wk = wk.reshape(Kout, KH * KW * C)

    xq = jnp.clip(jnp.round(x_nchw * inv_s_in) + zp_in, -128.0, 127.0) - zp_in
    xp = jnp.pad(xq, ((0, 0), (0, 0), (PAD, PAD), (PAD, PAD)))
    cols = [xp[:, :, di:di + H, dj:dj + W] for di in range(KH) for dj in range(KW)]
    p = jnp.stack(cols, axis=1)                                  # [N, 9, C, H, W]
    p = p.transpose(0, 3, 4, 1, 2).reshape(N, H * W, KH * KW * C)
    acc = jnp.einsum('nmk,ok->nom', p, wk)                       # [N, Kout, H*W]
    y = acc * rescale + bias.reshape(1, Kout, 1)
    yq = jnp.clip(jnp.round(y * inv_s_out) + zp_out, -128.0, 127.0)
    return ((yq - zp_out) * s_out).reshape(N, Kout, H, W)


if __name__ == "__main__":
    key = jax.random.PRNGKey(0)
    k_x, k_w = jax.random.split(key)

    # small NCHW shapes consistent with the module: batch=2, C_in=4, 16x16 spatial
    x = jax.random.normal(k_x, (2, 4, 16, 16), jnp.float32)
    wq_mat, bias, params = make_params(k_w, c_in=4, c_out=8)

    out = quantized_model_forward(x, wq_mat, params)
    jax.block_until_ready(out)
    assert out.shape == (2, 8, 16, 16)

    # sanity check against a pure-JAX reference of the same fake-quant conv
    # (tolerance allows at most one output quantization step of 0.02 for bias-path
    #  rounding ties -- bias rides the MXU in bf16, see make_params)
    ref = _reference_forward(x, wq_mat, bias, params)
    max_err = float(jnp.max(jnp.abs(out - ref)))
    assert max_err <= 0.025, f"kernel/reference mismatch: {max_err}"

    print("KERNEL_OK")
</pallas_src>

<mosaic_0001>
module attributes {stable_mosaic.version = 11 : i64} {
  func.func @_quant_conv_dequant_kernel(%arg0: i32, %arg1: memref<6xf32, #tpu.memory_space<smem>>, %arg2: memref<4x256xf32, #tpu.memory_space<vmem>>, %arg3: memref<8x72xbf16, #tpu.memory_space<vmem>>, %arg4: memref<9x8x256xf32, #tpu.memory_space<vmem>>, %arg5: memref<8x256xf32, #tpu.memory_space<vmem>>) attributes {dimension_semantics = [#tpu.dimension_semantics<parallel>], iteration_bounds = array<i64: 2>, scalar_prefetch = 0 : i64, scratch_operands = 0 : i64, tpu.core_type = #tpu.core_type<tc>, window_params = [{transform_indices = @transform_0, window_bounds = array<i64: 6>}, {transform_indices = @transform_1, window_bounds = array<i64: 4, 256>}, {pipeline_mode = #tpu.pipeline_mode<synchronous>, transform_indices = @transform_2, window_bounds = array<i64: 8, 72>}, {pipeline_mode = #tpu.pipeline_mode<synchronous>, transform_indices = @transform_3, window_bounds = array<i64: 9, 8, 256>}, {transform_indices = @transform_4, window_bounds = array<i64: 8, 256>}]} {
    %c0 = arith.constant 0 : index
    %0 = memref.load %arg1[%c0] : memref<6xf32, #tpu.memory_space<smem>>
    %c1 = arith.constant 1 : index
    %1 = memref.load %arg1[%c1] : memref<6xf32, #tpu.memory_space<smem>>
    %c2 = arith.constant 2 : index
    %2 = memref.load %arg1[%c2] : memref<6xf32, #tpu.memory_space<smem>>
    %c3 = arith.constant 3 : index
    %3 = memref.load %arg1[%c3] : memref<6xf32, #tpu.memory_space<smem>>
    %c4 = arith.constant 4 : index
    %4 = memref.load %arg1[%c4] : memref<6xf32, #tpu.memory_space<smem>>
    %c5 = arith.constant 5 : index
    %5 = memref.load %arg1[%c5] : memref<6xf32, #tpu.memory_space<smem>>
    %c0_0 = arith.constant 0 : index
    %c0_1 = arith.constant 0 : index
    %6 = vector.load %arg2[%c0_0, %c0_1] : memref<4x256xf32, #tpu.memory_space<vmem>>, vector<4x256xf32>
    %7 = vector.broadcast %0 : f32 to vector<4x256xf32>
    %8 = arith.mulf %6, %7 : vector<4x256xf32>
    %9 = math.roundeven %8 : vector<4x256xf32>
    %10 = vector.broadcast %1 : f32 to vector<4x256xf32>
    %11 = arith.addf %9, %10 : vector<4x256xf32>
    %cst = arith.constant -1.280000e+02 : f32
    %cst_2 = arith.constant 1.270000e+02 : f32
    %12 = vector.broadcast %cst : f32 to vector<4x256xf32>
    %13 = arith.maximumf %12, %11 : vector<4x256xf32>
    %14 = vector.broadcast %cst_2 : f32 to vector<4x256xf32>
    %15 = arith.minimumf %14, %13 : vector<4x256xf32>
    %16 = vector.broadcast %1 : f32 to vector<4x256xf32>
    %17 = arith.subf %15, %16 : vector<4x256xf32>
    %18 = tpu.iota {dimensions = array<i32: 0>} : vector<4x256xi32>
    %c0_i32 = arith.constant 0 : i32
    %19 = vector.broadcast %c0_i32 : i32 to vector<4x256xi32>
    %20 = arith.cmpi eq, %18, %19 : vector<4x256xi32>
    %21 = arith.extui %20 : vector<4x256xi1> to vector<4x256xi32>
    %22 = arith.sitofp %21 : vector<4x256xi32> to vector<4x256xf32>
    %23 = tpu.concatenate %17, %22 in 0 : vector<4x256xf32>, vector<4x256xf32> -> vector<8x256xf32>
    %c17_i32 = arith.constant 17 : i32
    %24 = tpu.dynamic_rotate %23 by %c17_i32 dim 1 : vector<8x256xf32>, i32 -> vector<8x256xf32>
    %c0_3 = arith.constant 0 : index
    %c0_4 = arith.constant 0 : index
    %c0_5 = arith.constant 0 : index
    %25 = vector.load %arg4[%c0_3, %c0_4, %c0_5] : memref<9x8x256xf32, #tpu.memory_space<vmem>>, vector<1x8x256xf32>
    %26 = vector.shape_cast %25 : vector<1x8x256xf32> to vector<8x256xf32>
    %27 = arith.mulf %24, %26 : vector<8x256xf32>
    %c16_i32 = arith.constant 16 : i32
    %28 = tpu.dynamic_rotate %23 by %c16_i32 dim 1 : vector<8x256xf32>, i32 -> vector<8x256xf32>
    %c1_6 = arith.constant 1 : index
    %c0_7 = arith.constant 0 : index
    %c0_8 = arith.constant 0 : index
    %29 = vector.load %arg4[%c1_6, %c0_7, %c0_8] : memref<9x8x256xf32, #tpu.memory_space<vmem>>, vector<1x8x256xf32>
    %30 = vector.shape_cast %29 : vector<1x8x256xf32> to vector<8x256xf32>
    %31 = arith.mulf %28, %30 : vector<8x256xf32>
    %c15_i32 = arith.constant 15 : i32
    %32 = tpu.dynamic_rotate %23 by %c15_i32 dim 1 : vector<8x256xf32>, i32 -> vector<8x256xf32>
    %c2_9 = arith.constant 2 : index
    %c0_10 = arith.constant 0 : index
    %c0_11 = arith.constant 0 : index
    %33 = vector.load %arg4[%c2_9, %c0_10, %c0_11] : memref<9x8x256xf32, #tpu.memory_space<vmem>>, vector<1x8x256xf32>
    %34 = vector.shape_cast %33 : vector<1x8x256xf32> to vector<8x256xf32>
    %35 = arith.mulf %32, %34 : vector<8x256xf32>
    %c1_i32 = arith.constant 1 : i32
    %36 = tpu.dynamic_rotate %23 by %c1_i32 dim 1 : vector<8x256xf32>, i32 -> vector<8x256xf32>
    %c3_12 = arith.constant 3 : index
    %c0_13 = arith.constant 0 : index
    %c0_14 = arith.constant 0 : index
    %37 = vector.load %arg4[%c3_12, %c0_13, %c0_14] : memref<9x8x256xf32, #tpu.memory_space<vmem>>, vector<1x8x256xf32>
    %38 = vector.shape_cast %37 : vector<1x8x256xf32> to vector<8x256xf32>
    %39 = arith.mulf %36, %38 : vector<8x256xf32>
    %c255_i32 = arith.constant 255 : i32
    %40 = tpu.dynamic_rotate %23 by %c255_i32 dim 1 : vector<8x256xf32>, i32 -> vector<8x256xf32>
    %c5_15 = arith.constant 5 : index
    %c0_16 = arith.constant 0 : index
    %c0_17 = arith.constant 0 : index
    %41 = vector.load %arg4[%c5_15, %c0_16, %c0_17] : memref<9x8x256xf32, #tpu.memory_space<vmem>>, vector<1x8x256xf32>
    %42 = vector.shape_cast %41 : vector<1x8x256xf32> to vector<8x256xf32>
    %43 = arith.mulf %40, %42 : vector<8x256xf32>
    %c241_i32 = arith.constant 241 : i32
    %44 = tpu.dynamic_rotate %23 by %c241_i32 dim 1 : vector<8x256xf32>, i32 -> vector<8x256xf32>
    %c6 = arith.constant 6 : index
    %c0_18 = arith.constant 0 : index
    %c0_19 = arith.constant 0 : index
    %45 = vector.load %arg4[%c6, %c0_18, %c0_19] : memref<9x8x256xf32, #tpu.memory_space<vmem>>, vector<1x8x256xf32>
    %46 = vector.shape_cast %45 : vector<1x8x256xf32> to vector<8x256xf32>
    %47 = arith.mulf %44, %46 : vector<8x256xf32>
    %c240_i32 = arith.constant 240 : i32
    %48 = tpu.dynamic_rotate %23 by %c240_i32 dim 1 : vector<8x256xf32>, i32 -> vector<8x256xf32>
    %c7 = arith.constant 7 : index
    %c0_20 = arith.constant 0 : index
    %c0_21 = arith.constant 0 : index
    %49 = vector.load %arg4[%c7, %c0_20, %c0_21] : memref<9x8x256xf32, #tpu.memory_space<vmem>>, vector<1x8x256xf32>
    %50 = vector.shape_cast %49 : vector<1x8x256xf32> to vector<8x256xf32>
    %51 = arith.mulf %48, %50 : vector<8x256xf32>
    %c239_i32 = arith.constant 239 : i32
    %52 = tpu.dynamic_rotate %23 by %c239_i32 dim 1 : vector<8x256xf32>, i32 -> vector<8x256xf32>
    %c8 = arith.constant 8 : index
    %c0_22 = arith.constant 0 : index
    %c0_23 = arith.constant 0 : index
    %53 = vector.load %arg4[%c8, %c0_22, %c0_23] : memref<9x8x256xf32, #tpu.memory_space<vmem>>, vector<1x8x256xf32>
    %54 = vector.shape_cast %53 : vector<1x8x256xf32> to vector<8x256xf32>
    %55 = arith.mulf %52, %54 : vector<8x256xf32>
    %56 = tpu.concatenate %27, %31, %35, %39, %23, %43, %47, %51, %55 in 0 : vector<8x256xf32>, vector<8x256xf32>, vector<8x256xf32>, vector<8x256xf32>, vector<8x256xf32>, vector<8x256xf32>, vector<8x256xf32>, vector<8x256xf32>, vector<8x256xf32> -> vector<72x256xf32>
    %57 = arith.truncf %56 : vector<72x256xf32> to vector<72x256xbf16>
    %c0_24 = arith.constant 0 : index
    %c0_25 = arith.constant 0 : index
    %58 = vector.load %arg3[%c0_24, %c0_25] : memref<8x72xbf16, #tpu.memory_space<vmem>>, vector<8x72xbf16>
    %cst_26 = arith.constant dense<0.000000e+00> : vector<8x256xf32>
    %59 = tpu.matmul %58, %57, %cst_26 {dimension_numbers = #tpu.dot_dimension_numbers<[1], [0], [0], [1], [0, 0, 1, 1], [], []>} : vector<8x72xbf16>, vector<72x256xbf16>, vector<8x256xf32> -> vector<8x256xf32>
    %60 = vector.broadcast %2 : f32 to vector<8x256xf32>
    %61 = arith.mulf %59, %60 : vector<8x256xf32>
    %62 = vector.broadcast %3 : f32 to vector<8x256xf32>
    %63 = arith.mulf %61, %62 : vector<8x256xf32>
    %64 = math.roundeven %63 : vector<8x256xf32>
    %65 = vector.broadcast %4 : f32 to vector<8x256xf32>
    %66 = arith.addf %64, %65 : vector<8x256xf32>
    %cst_27 = arith.constant -1.280000e+02 : f32
    %cst_28 = arith.constant 1.270000e+02 : f32
    %67 = vector.broadcast %cst_27 : f32 to vector<8x256xf32>
    %68 = arith.maximumf %67, %66 : vector<8x256xf32>
    %69 = vector.broadcast %cst_28 : f32 to vector<8x256xf32>
    %70 = arith.minimumf %69, %68 : vector<8x256xf32>
    %71 = vector.broadcast %4 : f32 to vector<8x256xf32>
    %72 = arith.subf %70, %71 : vector<8x256xf32>
    %73 = vector.broadcast %5 : f32 to vector<8x256xf32>
    %74 = arith.mulf %72, %73 : vector<8x256xf32>
    %c0_29 = arith.constant 0 : index
    %c0_30 = arith.constant 0 : index
    %75 = vector.load %arg5[%c0_29, %c0_30] : memref<8x256xf32, #tpu.memory_space<vmem>>, vector<8x256xf32>
    tpu.vector_store %arg5[%c0_29, %c0_30], %74 {strides = array<i32>} : memref<8x256xf32, #tpu.memory_space<vmem>>, vector<8x256xf32>,
    return
  }
  func.func @transform_0(%arg0: i32) -> i32 {
    %c0_i32 = arith.constant 0 : i32
    %c0_i32_0 = arith.constant 0 : i32
    return %c0_i32 : i32
  }
  func.func @transform_1(%arg0: i32) -> (i32, i32) {
    %c0_i32 = arith.constant 0 : i32
    %c0_i32_0 = arith.constant 0 : i32
    return %c0_i32, %arg0 : i32, i32
  }
  func.func @transform_2(%arg0: i32) -> (i32, i32) {
    %c0_i32 = arith.constant 0 : i32
    %c0_i32_0 = arith.constant 0 : i32
    %c0_i32_1 = arith.constant 0 : i32
    return %c0_i32, %c0_i32_0 : i32, i32
  }
  func.func @transform_3(%arg0: i32) -> (i32, i32, i32) {
    %c0_i32 = arith.constant 0 : i32
    %c0_i32_0 = arith.constant 0 : i32
    %c0_i32_1 = arith.constant 0 : i32
    %c0_i32_2 = arith.constant 0 : i32
    return %c0_i32, %c0_i32_0, %c0_i32_1 : i32, i32, i32
  }
  func.func @transform_4(%arg0: i32) -> (i32, i32) {
    %c0_i32 = arith.constant 0 : i32
    %c0_i32_0 = arith.constant 0 : i32
    return %c0_i32, %arg0 : i32, i32
  }
}

</mosaic_0001>

<bundles_post_ra>
// kernel: quantized_model_forward.1
= control target key start
LH: loop header
LB: loop body
LE: loop exit
PB: predicated region body
PF: predicated region fallthrough
CT: control target
= control target key end

     0   :  { %9 = vsyncpa [#allocation3], 0  ;;  %s631_s15 = smov 0   ;;  %s742_s0 = inlined_call_operand.vmem [shape: f32[6], index: 0, kind: input, shape index: {}]   ;;  %s743_s1 = inlined_call_operand.vmem [shape: f32[4,512], index: 1, kind: input, shape index: {}]   ;;  %s744_s2 = inlined_call_operand.vmem [shape: bf16[8,72], index: 2, kind: input, shape index: {}]   ;;  %s745_s3 = inlined_call_operand.vmem [shape: f32[9,8,256], index: 3, kind: input, shape index: {}]   ;;  %s746_s4 = inlined_call_operand.vmem [shape: f32[8,512], index: 4, kind: output, shape index: {}]  }
   0x1 LB: > { %s482_s16 = sadd.s32 4294967295, %s594_s15   ;;  %p484_p0 = scmp.ge.s32.totalorder %s594_s15, 1  ;;  %s594_s15 = sphi %s631_s15, %s15_s15  }
   0x2   : > { %p135_p1 = scmp.lt.s32.totalorder %s594_s15, 3  ;;  %s147_s19 = sshll.u32 %s742_s0, 4  ;;  %s148_s19 = int_to_ptr.vmem [resolvable:$true] %s147_s19 }
   0x3   : > { %p549_p3 = scmp.eq.s32.totalorder %s482_s16, 0  ;;  %s596_s20 = smov [#allocation2]  }
   0x4   : > { %p136_p2 = pnand %p484_p0, %p135_p1 }
   0x6   : > { %p545_p4 = pneg %p136_p2  ;;  %175 = sbr.rel (%p136_p2) target bundleno = 363 (0x16b), region = 36 }
   0x8   : > { %p546_p5 = pnand %p549_p3, %p545_p4 }
   0xa   : > { %548 = dma.vmem_to_smem (!%p546_p5), %s148_s19, 16, %s596_s20, [#allocation3]  }
   0xb   : > { %589 = dma.done.wait (%p549_p3), [#allocation3], 16  }
   0xc   : > { %591 = vsyncadd (%p549_p3), [#allocation3], 4294967280 }
   0xd   : > { %182 = sfence }
   0xe   : > { %s489_s21 = sshll.u32 %s482_s16, 1  ;;  %s216_s22 = sld [smem:[#allocation2]]  ;;  %v231_v10 = vlaneseq  ;;  %v597_v17 = vmov 0.0   ;;  %vm245_vm2 = vcmask 1043456   ;;  %v511_v29 = vld [vmem:[%s745_s3 + $0x80] sm:$0xff]  ;;  %v512_v30 = vld [vmem:[%s745_s3 + $0x88] sm:$0xff] }
   0xf   : > { %p204_p6 = scmp.lt.s32.totalorder %s489_s21, 3  ;;  %s493_s27 = sld [smem:[#allocation2 + $0x1]]  ;;  %v509_v33 = vld [vmem:[%s745_s3 + $0x70] sm:$0xff]  ;;  %v510_v38 = vld [vmem:[%s745_s3 + $0x78] sm:$0xff]  ;;  %v507_v39 = vld [vmem:[%s745_s3 + $0x60] sm:$0xff]  ;;  %vm356_vm11 = vcmask 588800  }
  0x10   : > { %v232_v14 = vshrl.u32 %v231_v10, 7  ;;  %s598_s28 = smov 113   ;;  %s599_s29 = smov 111   ;;  %v670_v27 = vand.u32 127, %v231_v10  ;;  %v508_v40 = vld [vmem:[%s745_s3 + $0x68] sm:$0xff]  ;;  %v505_v54 = vld [vmem:[%s745_s3 + $0x50] sm:$0xff] }
  0x11   : > { %s748_s21 = smov (!%p204_p6, %s489_s21), 3  ;;  %s600_s30 = smov 112   ;;  %v506_v55 = vld [vmem:[%s745_s3 + $0x58] sm:$0xff] }
  0x12   : > { %s490_s23 = sshll.u32 %s748_s21, 2  ;;  %vm233_vm1 = vcmp.eq.s32.totalorder %v232_v14, 0  ;;  %s601_s5 = smov 127   ;;  %vm325_vm3 = vcmp.lt.s32.totalorder %v670_v27, 112  ;;  %vm337_vm4 = vcmp.lt.s32.totalorder %v670_v27, 111  ;;  %vm313_vm5 = vcmp.lt.s32.totalorder %v670_v27, 113 }
  0x13   : > { %s207_s26 = scalar_lea.vmem %s743_s1, %s490_s23  ;;  %v498_v18 = vsel %vm233_vm1, 1.0, %v597_v17  ;;  %s602_s6 = smov 15   ;;  %vm301_vm6 = vcmp.lt.s32.totalorder %v670_v27, 127  ;;  %vm289_vm7 = vcmp.lt.s32.totalorder %v670_v27, 1  ;;  %vm277_vm8 = vcmp.lt.s32.totalorder %v670_v27, 15 }
  0x14   : > { %v223_v0 = vstv %s216_s22  ;;  %v222_v1 = vld [vmem:[%s207_s26] sm:$0xff]  ;;  %v243_v19 = vrot.slane %v498_v18, 4  ;;  %s603_s7 = smov 1   ;;  %s604_s8 = smov 17   ;;  %vm254_vm9 = vcmp.lt.s32.totalorder %v670_v27, 17  ;;  %vm265_vm10 = vcmp.lt.s32.totalorder %v670_v27, 16 }
  0x15   : > { %v224_v2 = vmul.f32 %v223_v0, %v222_v1  ;;  %v226_v9 = vstv %s493_s27  ;;  %s605_s9 = smov 16   ;;  %s494_s22 = sld [smem:[#allocation2 + $0x2]] }
  0x16   : > { %s495_s23 = sld [smem:[#allocation2 + $0x3]]  ;;  %s492_s26 = sshll.u32 %s748_s21, 3 }
  0x17   : > { %v519_v3 = vcvt.f32.s32 %v224_v2  ;;  %v517_v4 = vand.u32 2147483647, %v224_v2  ;;  %v522_v6 = vand.u32 2147483648, %v224_v2  ;;  %s496_s24 = sld [smem:[#allocation2 + $0x4]] }
  0x18   : > { %s497_s25 = sld [smem:[#allocation2 + $0x5]] }
  0x19   : > { %v520_v5 = vcvt.s32.f32 %v519_v3  ;;  %vm518_vm0 = vcmp.lt.f32.partialorder %v517_v4, 8388608.0  ;;  %v503_v3 = vld [vmem:[%s745_s3 + $0x30] sm:$0xff]  ;;  %v504_v4 = vld [vmem:[%s745_s3 + $0x38] sm:$0xff] }
  0x1b   : > { %v521_v7 = vand.u32 2147483647, %v520_v5  ;;  %v501_v5 = vld [vmem:[%s745_s3 + $0x20] sm:$0xff] }
  0x1d   : > { %v523_v8 = vor.u32 %v522_v6, %v521_v7  ;;  %v502_v6 = vld [vmem:[%s745_s3 + $0x28] sm:$0xff] }
  0x1f   : > { %v524_v11 = vsel %vm518_vm0, %v523_v8, %v224_v2 }
  0x20   : > { %v227_v12 = vadd.f32 %v524_v11, %v226_v9 }
  0x22   : > { %v228_v13 = vmax.f32 %v227_v12, -128.0 }
  0x24   : > { %v229_v15 = vmin.f32 %v228_v13, 127.0 }
  0x26   : > { %v230_v16 = vsub.f32 %v229_v15, %v226_v9 }
  0x28   : > { %237 = vst [vmem:[#allocation1] ss:$2 sm:$0xff] %v230_v16 }
  0x2f   : > { %v238_v20 = vld.sshfl [vmem:[#allocation1] sm:$0xff pattern:$0x75316420]  ;;  %v239_v22 = vld.sshfl [vmem:[#allocation1 + $0x8] sm:$0xff pattern:$0x75316420] }
  0x30   : > { %v649_v21 = vsel %vm245_vm2, %v238_v20, %v243_v19  ;;  %v655_v23 = vsel %vm245_vm2, %v239_v22, %v243_v19 }
  0x31   : > { %309 = vrot.lane.b32.xlu1 %v649_v21, %s598_s28  ;;  %333 = vrot.lane.b32.xlu0 %v649_v21, %s599_s29 }
  0x32   : > { %321 = vrot.lane.b32.xlu2 %v649_v21, %s600_s30 }
  0x39   : > { %311 = vrot.lane.b32.xlu1 %v655_v23, %s598_s28  ;;  %335 = vrot.lane.b32.xlu0 %v655_v23, %s599_s29  ;;  %s213_s29 = scalar_lea.vmem %s746_s4, %s492_s26 }
  0x3a   : > { %323 = vrot.lane.b32.xlu2 %v655_v23, %s600_s30 }
  0x41   : > { %299 = vrot.lane.b32.xlu1 %v655_v23, %s601_s5  ;;  %297 = vrot.lane.b32.xlu0 %v649_v21, %s601_s5 }
  0x42   : > { %273 = vrot.lane.b32.xlu2 %v649_v21, %s602_s6 }
  0x49   : > { %285 = vrot.lane.b32.xlu1 %v649_v21, %s603_s7  ;;  %275 = vrot.lane.b32.xlu0 %v655_v23, %s602_s6 }
  0x4a   : > { %287 = vrot.lane.b32.xlu2 %v655_v23, %s603_s7 }
  0x51   : > { %250 = vrot.lane.b32.xlu1 %v655_v23, %s604_s8  ;;  %248 = vrot.lane.b32.xlu0 %v649_v21, %s604_s8 }
  0x52   : > { %261 = vrot.lane.b32.xlu2 %v649_v21, %s605_s9 }
  0x59   : > { %263 = vrot.lane.b32.xlu0 %v655_v23, %s605_s9 }
  0x8c   : > { %v322_v24 = vpop.permute.xlu2 %321 }
  0x94   : > { %v324_v28 = vpop.permute.xlu2 %323 }
  0x95   : > { %v326_v34 = vsel %vm325_vm3, %v322_v24, %v324_v28  ;;  %v327_v35 = vsel %vm325_vm3, %v324_v28, %v322_v24  ;;  %v500_v28 = vld [vmem:[%s745_s3 + $0x18] sm:$0xff] }
  0x96   : > { %v331_v48 = vmul.f32 %v509_v33, %v326_v34  ;;  %v332_v49 = vmul.f32 %v510_v38, %v327_v35  ;;  %v392_v38 = vstv %s494_s22 }
  0x9c   : > { %v274_v47 = vpop.permute.xlu2 %273 }
  0xa3   : > { %v310_v25 = vpop.permute.xlu1 %309  ;;  %v334_v26 = vpop.permute.xlu0 %333 }
  0xa4   : > { %v288_v2 = vpop.permute.xlu2 %287 }
  0xab   : > { %v312_v31 = vpop.permute.xlu1 %311  ;;  %v336_v32 = vpop.permute.xlu0 %335 }
  0xac   : > { %v338_v36 = vsel %vm337_vm4, %v334_v26, %v336_v32  ;;  %v339_v37 = vsel %vm337_vm4, %v336_v32, %v334_v26  ;;  %v314_v41 = vsel %vm313_vm5, %v310_v25, %v312_v31  ;;  %v315_v42 = vsel %vm313_vm5, %v312_v31, %v310_v25  ;;  %v262_v22 = vpop.permute.xlu2 %261  ;;  %v499_v26 = vld [vmem:[%s745_s3 + $0x10] sm:$0xff] }
  0xad   : > { %v343_v43 = vmul.f32 %v511_v29, %v338_v36  ;;  %v344_v44 = vmul.f32 %v512_v30, %v339_v37  ;;  %v319_v50 = vmul.f32 %v507_v39, %v314_v41  ;;  %v320_v51 = vmul.f32 %v508_v40, %v315_v42  ;;  %v355_v37 = vld [vmem:[%s744_s2] sm:$0xf] }
  0xae   : > { %v395_v40 = vstv %s495_s23 }
  0xaf   : > { %v353_v45 = vpack.c.bf16 %v343_v43, %v343_v43  ;;  %v354_v46 = vpack.c.bf16 %v344_v44, %v344_v44  ;;  %v351_v60 = vpack.c.bf16 %v331_v48, %v319_v50  ;;  %v352_v61 = vpack.c.bf16 %v332_v49, %v320_v51 }
  0xb1   : > { %v361_v52 = vsel %vm245_vm2, %v353_v45, 0  ;;  %v364_v53 = vsel %vm245_vm2, %v354_v46, 0 }
  0xb2   : > { %369 = vmatpush.bf16.msra.mxu0 %v361_v52  ;;  %382 = vmatpush.bf16.msra.mxu1 %v364_v53 }
  0xb3   : > { %v300_v56 = vpop.permute.xlu1 %299  ;;  %v298_v57 = vpop.permute.xlu0 %297 }
  0xb4   : > { %v302_v58 = vsel %vm301_vm6, %v298_v57, %v300_v56  ;;  %v303_v59 = vsel %vm301_vm6, %v300_v56, %v298_v57 }
  0xb5   : > { %v307_v62 = vmul.f32 %v505_v54, %v302_v58  ;;  %v308_v63 = vmul.f32 %v506_v55, %v303_v59  ;;  %v400_v59 = vstv %s496_s24 }
  0xb6   : > { %370 = vmatpush.bf16.msra.mxu0 %v351_v60  ;;  %383 = vmatpush.bf16.msra.mxu1 %v352_v61 }
  0xb7   : > { %v349_v0 = vpack.c.bf16 %v307_v62, %v649_v21  ;;  %v350_v1 = vpack.c.bf16 %v308_v63, %v655_v23  ;;  %v257_v21 = vld [vmem:[%s745_s3] sm:$0xff]  ;;  %v258_v23 = vld [vmem:[%s745_s3 + $0x8] sm:$0xff] }
  0xba   : > { %371 = vmatpush.bf16.msra.mxu0 %v349_v0  ;;  %384 = vmatpush.bf16.msra.mxu1 %v350_v1 }
  0xbb   : > { %v286_v7 = vpop.permute.xlu1 %285  ;;  %v276_v8 = vpop.permute.xlu0 %275 }
  0xbc   : > { %v290_v9 = vsel %vm289_vm7, %v286_v7, %v288_v2  ;;  %v291_v10 = vsel %vm289_vm7, %v288_v2, %v286_v7  ;;  %v278_v11 = vsel %vm277_vm8, %v274_v47, %v276_v8  ;;  %v279_v12 = vsel %vm277_vm8, %v276_v8, %v274_v47 }
  0xbd   : > { %v295_v13 = vmul.f32 %v503_v3, %v291_v10  ;;  %v296_v14 = vmul.f32 %v504_v4, %v290_v9  ;;  %v283_v15 = vmul.f32 %v501_v5, %v279_v12  ;;  %v284_v16 = vmul.f32 %v502_v6, %v278_v11 }
  0xbe   : > { %v409_v4 = vstv %s497_s25 }
  0xbf   : > { %v347_v17 = vpack.c.bf16 %v295_v13, %v283_v15  ;;  %v348_v18 = vpack.c.bf16 %v296_v14, %v284_v16 }
  0xc1   : > { %372 = vmatpush.bf16.msra.mxu0 %v347_v17  ;;  %385 = vmatpush.bf16.msra.mxu1 %v348_v18 }
  0xc3   : > { %v249_v19 = vpop.permute.xlu0 %248  ;;  %v251_v20 = vpop.permute.xlu1 %250 }
  0xc4   : > { %v255_v24 = vsel %vm254_vm9, %v249_v19, %v251_v20  ;;  %v256_v25 = vsel %vm254_vm9, %v251_v20, %v249_v19 }
  0xc5   : > { %v259_v32 = vmul.f32 %v257_v21, %v256_v25  ;;  %v260_v33 = vmul.f32 %v258_v23, %v255_v24 }
  0xcb   : > { %v264_v29 = vpop.permute.xlu0 %263 }
  0xcc   : > { %v266_v30 = vsel %vm265_vm10, %v262_v22, %v264_v29  ;;  %v267_v31 = vsel %vm265_vm10, %v264_v29, %v262_v22 }
  0xcd   : > { %v271_v27 = vmul.f32 %v499_v26, %v267_v31  ;;  %v272_v34 = vmul.f32 %v500_v28, %v266_v30 }
  0xcf   : > { %v345_v35 = vpack.c.bf16 %v271_v27, %v259_v32  ;;  %v346_v36 = vpack.c.bf16 %v272_v34, %v260_v33 }
  0xd1   : > { %373 = vmatpush.bf16.msra.mxu0 %v345_v35  ;;  %386 = vmatpush.bf16.msra.mxu1 %v346_v36 }
  0xd4   : > { %513 = vmatmul.msk.bf16.vlgmr.msra.gmra.mxu0 %vm356_vm11, %v355_v37  ;;  %514 = vmatmul.msk.bf16.vlgmr.msra.gmra.mxu1 %vm356_vm11, %v355_v37 }
 0x151   : > { %v375_v39 = vpop.f32.mrf.mxu0  ;;  %v388_v41 = vpop.f32.mrf.mxu1 }
 0x152   : > { %v393_v42 = vmul.f32 %v392_v38, %v375_v39  ;;  %v394_v43 = vmul.f32 %v392_v38, %v388_v41 }
 0x154   : > { %v396_v44 = vmul.f32 %v395_v40, %v393_v42  ;;  %v397_v45 = vmul.f32 %v395_v40, %v394_v43 }
 0x156   : > { %v527_v46 = vcvt.f32.s32 %v396_v44  ;;  %v535_v47 = vcvt.f32.s32 %v397_v45  ;;  %v525_v49 = vand.u32 2147483647, %v396_v44  ;;  %v530_v54 = vand.u32 2147483648, %v396_v44 }
 0x157   : > { %v533_v55 = vand.u32 2147483647, %v397_v45  ;;  %v538_v57 = vand.u32 2147483648, %v397_v45 }
 0x158   : > { %v528_v48 = vcvt.s32.f32 %v527_v46  ;;  %v536_v50 = vcvt.s32.f32 %v535_v47  ;;  %vm526_vm12 = vcmp.lt.f32.partialorder %v525_v49, 8388608.0 }
 0x159   : > { %v377_v51 = vpop.f32.mrf.mxu0  ;;  %v390_v52 = vpop.f32.mrf.mxu1  ;;  %vm534_vm13 = vcmp.lt.f32.partialorder %v533_v55, 8388608.0 }
 0x15a   : > { %v529_v53 = vand.u32 2147483647, %v528_v48  ;;  %v537_v56 = vand.u32 2147483647, %v536_v50 }
 0x15c   : > { %v531_v58 = vor.u32 %v530_v54, %v529_v53  ;;  %v539_v60 = vor.u32 %v538_v57, %v537_v56 }
 0x15e   : > { %v532_v61 = vsel %vm526_vm12, %v531_v58, %v396_v44  ;;  %v540_v63 = vsel %vm534_vm13, %v539_v60, %v397_v45 }
 0x15f   : > { %v401_v62 = vadd.f32 %v532_v61, %v400_v59  ;;  %v402_v0 = vadd.f32 %v540_v63, %v400_v59 }
 0x161   : > { %v403_v1 = vmax.f32 %v401_v62, -128.0  ;;  %v404_v2 = vmax.f32 %v402_v0, -128.0 }
 0x163   : > { %v405_v3 = vmin.f32 %v403_v1, 127.0  ;;  %v406_v5 = vmin.f32 %v404_v2, 127.0 }
 0x165   : > { %v407_v6 = vsub.f32 %v405_v3, %v400_v59  ;;  %v408_v7 = vsub.f32 %v406_v5, %v400_v59 }
 0x167   : > { %v410_v8 = vmul.f32 %v409_v4, %v407_v6  ;;  %v411_v9 = vmul.f32 %v409_v4, %v408_v7 }
 0x169   : > { %412 = vst [vmem:[%s213_s29] sm:$0xff] %v410_v8 }
 0x16a   : > { %413 = vst [vmem:[%s213_s29 + $0x8] sm:$0xff] %v411_v9 }
 0x16b PF: > { %s15_s15 = sadd.s32 1, %s594_s15  }
 0x16c   : > { %p12_p7 = scmp.ge.s32.totalorder %s15_s15, 4  }
 0x16e   :  { %14 = sbr.rel (!%p12_p7) target bundleno = 1 (0x1), region = 78 }
 0x173   :  { %436 = vsyncpa [#allocation3], 1 }
 0x174   :  { %438 = vsyncpa [#allocation3 + $0x1], 1 }

</bundles_post_ra>
